<compile_context>
chip_gen: v5e
topology: v5e:2x2
jax: 0.10.0
libtpu: 0.0.40
codegen_flags: <defaults>
</compile_context>

<pallas_src>
import functools

import jax
import jax.numpy as jnp
from jax import lax
from jax.experimental import pallas as pl
from jax.experimental.pallas import tpu as pltpu

EPS = 1e-5
MOMENTUM = 0.9


def _hw_config():
    """Generation-aware VMEM / tiling budgets.  v5e/v6e have 128 MiB VMEM,
    v7x-class parts only 64 MiB; fall back to the conservative settings if the
    hardware query is unavailable."""
    vmem_cap = 64 * 1024 * 1024
    try:
        vmem_cap = int(pltpu.get_tpu_info().vmem_capacity_bytes)
    except Exception:
        pass
    if vmem_cap >= 100 * 1024 * 1024:          # v5e / v6e (128 MiB VMEM)
        return dict(vmem_limit=96 * 1024 * 1024,
                    tile_budget=8 * 1024 * 1024,
                    lane_target=16384,
                    fastpath_bytes=16 * 1024 * 1024)
    # v7x-class: 64 MiB physical VMEM -> smaller working set, headroom for
    # compiler-internal scratch.
    return dict(vmem_limit=40 * 1024 * 1024,
                tile_budget=4 * 1024 * 1024,
                lane_target=8192,
                fastpath_bytes=8 * 1024 * 1024)


def _pick_tile(dim, target, align):
    """Largest multiple of `align` that divides `dim` and is <= `target`.
    Falls back to the full dimension (always legal for a BlockSpec: a block dim
    equal to the array dim needs no (8, 128) alignment)."""
    if dim <= target:
        return dim
    t = (target // align) * align
    while t >= align:
        if dim % t == 0:
            return t
        t -= align
    return dim


# ---------------------------------------------------------------------------
# Kernels
# ---------------------------------------------------------------------------
def _bn_stats_kernel(x_ref, gamma_ref, beta_ref, mm_ref, mv_ref,       # inputs
                     scale_ref, shift_ref, new_mm_ref, new_mv_ref,     # outputs
                     sum_sc, sq_sc,                                    # scratch
                     *, inv_count, momentum, eps, reduce_last):
    """Pass 1: accumulate lane-wide per-channel sum / sum-of-squares across the
    reduction grid axis (axis 1); at the last step do the single cross-lane
    reduce and emit fused scale/shift + moving mean/var updates."""
    r = pl.program_id(1)

    @pl.when(r == 0)
    def _init():
        sum_sc[...] = jnp.zeros_like(sum_sc)
        sq_sc[...] = jnp.zeros_like(sq_sc)

    # Hot loop: only the leading (batch) axis is reduced per step -> pure
    # VALU adds/muls; the cross-lane reduction is deferred to the finalize so
    # the streaming pass stays HBM-bound instead of XLU-slot-bound.
    x = x_ref[...].astype(jnp.float32)
    sum_sc[...] += jnp.sum(x, axis=0, keepdims=True)
    sq_sc[...] += jnp.sum(x * x, axis=0, keepdims=True)

    @pl.when(r == pl.num_programs(1) - 1)
    def _finalize():
        total = sum_sc[...]
        total_sq = sq_sc[...]
        if reduce_last:                     # conv path: fold the lane axis once
            total = jnp.sum(total, axis=-1, keepdims=True)
            total_sq = jnp.sum(total_sq, axis=-1, keepdims=True)
        mean = total * inv_count
        # E[x^2] - mean^2 can dip slightly negative in f32 -> clamp before rsqrt.
        var = jnp.maximum(total_sq * inv_count - mean * mean, 0.0)
        inv_std = lax.rsqrt(var + eps)      # per-channel only (EUP)
        scale = gamma_ref[...] * inv_std
        shift = beta_ref[...] - mean * scale
        scale_ref[...] = scale
        shift_ref[...] = shift
        new_mm_ref[...] = momentum * mm_ref[...] + (1.0 - momentum) * mean
        new_mv_ref[...] = momentum * mv_ref[...] + (1.0 - momentum) * var


def _bn_apply_kernel(x_ref, scale_ref, shift_ref, y_ref):
    """Pass 2: y = x * scale + shift (per-channel scale/shift broadcast)."""
    x = x_ref[...].astype(jnp.float32)
    y_ref[...] = (x * scale_ref[...] + shift_ref[...]).astype(y_ref.dtype)


def _bn_fused_kernel(x_ref, gamma_ref, beta_ref, mm_ref, mv_ref,
                     y_ref, new_mm_ref, new_mv_ref,
                     *, reduce_axes, inv_count, momentum, eps):
    """Small-input fast path: x resident in VMEM -> stats + normalize in one
    pass (2x HBM traffic instead of 3x).  Uses the centered variance."""
    x = x_ref[...].astype(jnp.float32)
    mean = jnp.sum(x, axis=reduce_axes, keepdims=True) * inv_count
    xc = x - mean
    var = jnp.sum(xc * xc, axis=reduce_axes, keepdims=True) * inv_count
    inv_std = lax.rsqrt(var + eps)
    y_ref[...] = (xc * (gamma_ref[...] * inv_std) + beta_ref[...]).astype(y_ref.dtype)
    new_mm_ref[...] = momentum * mm_ref[...] + (1.0 - momentum) * mean
    new_mv_ref[...] = momentum * mv_ref[...] + (1.0 - momentum) * var


# ---------------------------------------------------------------------------
# Drivers
# ---------------------------------------------------------------------------
def _run_bn_tiled(x_arr, gamma, beta, mm, mv, *, grid, x_spec, vec_spec,
                  vec_shape, scratch_shape, reduce_last, inv_count, vmem_limit):
    vec_sds = jax.ShapeDtypeStruct(vec_shape, jnp.float32)

    stats_kernel = functools.partial(
        _bn_stats_kernel, inv_count=inv_count, momentum=MOMENTUM, eps=EPS,
        reduce_last=reduce_last)

    scale, shift, new_mm, new_mv = pl.pallas_call(
        stats_kernel,
        grid_spec=pltpu.PrefetchScalarGridSpec(
            num_scalar_prefetch=0,
            grid=grid,
            in_specs=[x_spec, vec_spec, vec_spec, vec_spec, vec_spec],
            out_specs=(vec_spec, vec_spec, vec_spec, vec_spec),
            scratch_shapes=[pltpu.VMEM(scratch_shape, jnp.float32),
                            pltpu.VMEM(scratch_shape, jnp.float32)]),
        out_shape=(vec_sds, vec_sds, vec_sds, vec_sds),
        compiler_params=pltpu.CompilerParams(
            dimension_semantics=("parallel", "arbitrary"),
            vmem_limit_bytes=vmem_limit),
    )(x_arr, gamma, beta, mm, mv)

    y = pl.pallas_call(
        _bn_apply_kernel,
        grid_spec=pltpu.PrefetchScalarGridSpec(
            num_scalar_prefetch=0,
            grid=grid,
            in_specs=[x_spec, vec_spec, vec_spec],
            out_specs=x_spec),
        out_shape=jax.ShapeDtypeStruct(x_arr.shape, x_arr.dtype),
        compiler_params=pltpu.CompilerParams(
            dimension_semantics=("parallel", "parallel"),
            vmem_limit_bytes=vmem_limit),
    )(x_arr, scale, shift)

    return y, new_mm, new_mv


def _run_bn_fused(x_arr, gamma, beta, mm, mv, *, vec_shape, reduce_axes,
                  inv_count, vmem_limit):
    vec_sds = jax.ShapeDtypeStruct(vec_shape, jnp.float32)
    kernel = functools.partial(_bn_fused_kernel, reduce_axes=reduce_axes,
                               inv_count=inv_count, momentum=MOMENTUM, eps=EPS)
    return pl.pallas_call(
        kernel,
        out_shape=(jax.ShapeDtypeStruct(x_arr.shape, x_arr.dtype),
                   vec_sds, vec_sds),
        compiler_params=pltpu.CompilerParams(vmem_limit_bytes=vmem_limit),
    )(x_arr, gamma, beta, mm, mv)


# ---------------------------------------------------------------------------
# Public forward (mirrors BatchNorm.forward, training branch)
# ---------------------------------------------------------------------------
def batch_norm_forward(x, gamma, beta, moving_mean, moving_var, *,
                       force_tiled=False):
    """x: (N, F) with params (1, F), or (N, C, H, W) with params (1, C, 1, 1).
    Returns (Y, new_moving_mean, new_moving_var) with the original shapes."""
    assert x.ndim in (2, 4)
    # TODO(synk): only the training branch (grad-enabled path) of batch_norm is
    # implemented, matching the module's forward during training.

    cfg = _hw_config()
    budget = cfg["tile_budget"]
    eb = max(int(x.dtype.itemsize), 4)      # account for in-kernel f32 copies

    if x.ndim == 2:
        M, F = x.shape
        x_work = x
        vec_shape = (1, F)
        reduce_axes = (0,)
        inv_count = 1.0 / float(M)
    else:
        N, C, H, W = x.shape
        HW = H * W
        x_work = x.reshape(N, C, HW)        # free view: C->sublanes, HW->lanes
        vec_shape = (1, C, 1)
        reduce_axes = (0, 2)
        inv_count = 1.0 / float(N * HW)

    gamma_f = gamma.reshape(vec_shape).astype(jnp.float32)
    beta_f = beta.reshape(vec_shape).astype(jnp.float32)
    mm_f = moving_mean.reshape(vec_shape).astype(jnp.float32)
    mv_f = moving_var.reshape(vec_shape).astype(jnp.float32)

    use_fast = (not force_tiled) and (x.size * 4 <= cfg["fastpath_bytes"])

    if use_fast:
        y_w, new_mm, new_mv = _run_bn_fused(
            x_work, gamma_f, beta_f, mm_f, mv_f, vec_shape=vec_shape,
            reduce_axes=reduce_axes, inv_count=inv_count,
            vmem_limit=cfg["vmem_limit"])
    elif x.ndim == 2:
        M, F = x.shape
        tf = _pick_tile(F, cfg["lane_target"], 128)          # lanes (channels)
        tm_cap = max(8, (budget // (tf * eb)) // 8 * 8)      # byte-budget cap
        tm = _pick_tile(M, tm_cap, 8)                        # sublanes (batch)
        grid = (F // tf, M // tm)            # (channel blocks, reduction blocks)
        x_spec = pl.BlockSpec((tm, tf), lambda c, m: (m, c))
        vec_spec = pl.BlockSpec((1, tf), lambda c, m: (0, c))
        y_w, new_mm, new_mv = _run_bn_tiled(
            x_work, gamma_f, beta_f, mm_f, mv_f, grid=grid, x_spec=x_spec,
            vec_spec=vec_spec, vec_shape=vec_shape, scratch_shape=(1, tf),
            reduce_last=False, inv_count=inv_count,
            vmem_limit=cfg["vmem_limit"])
    else:
        N, C, H, W = x.shape
        HW = H * W
        thw = _pick_tile(HW, cfg["lane_target"], 128)        # lanes (spatial)
        tc_cap = max(8, (budget // (thw * eb)) // 8 * 8)     # byte-budget cap
        tc = _pick_tile(C, min(256, tc_cap), 8)              # sublanes (channels)
        max_nb = max(1, budget // (tc * thw * eb))
        nb = 1                               # fold several images per grid step
        for d in range(min(N, max_nb), 0, -1):
            if N % d == 0:
                nb = d
                break
        cblocks, hwblocks, nblocks = C // tc, HW // thw, N // nb
        grid = (cblocks, nblocks * hwblocks)  # reduction axis folds N and HW tiles
        x_spec = pl.BlockSpec(
            (nb, tc, thw), lambda c, r: (r // hwblocks, c, r % hwblocks))
        vec_spec = pl.BlockSpec((1, tc, 1), lambda c, r: (0, c, 0))
        # TODO(synk): when cblocks == 1 the stats pass runs on a single
        # TensorCore on v7x; a 2-way parallel split of the reduction axis with a
        # partial-sum epilogue would recover the idle core.
        y_w, new_mm, new_mv = _run_bn_tiled(
            x_work, gamma_f, beta_f, mm_f, mv_f, grid=grid, x_spec=x_spec,
            vec_spec=vec_spec, vec_shape=vec_shape,
            scratch_shape=(1, tc, thw), reduce_last=True, inv_count=inv_count,
            vmem_limit=cfg["vmem_limit"])

    return (y_w.reshape(x.shape),
            new_mm.reshape(moving_mean.shape).astype(moving_mean.dtype),
            new_mv.reshape(moving_var.shape).astype(moving_var.dtype))


# ---------------------------------------------------------------------------
# Self-test
# ---------------------------------------------------------------------------
if __name__ == "__main__":
    key = jax.random.PRNGKey(0)
    k1, k2 = jax.random.split(key)

    # ---- conv-style input (num_dims == 4) ----
    N, C, H, W = 2, 4, 16, 16
    x4 = jax.random.normal(k1, (N, C, H, W), dtype=jnp.float32)
    gamma4 = jnp.ones((1, C, 1, 1), jnp.float32)
    beta4 = jnp.zeros((1, C, 1, 1), jnp.float32)
    mm4 = jnp.zeros((1, C, 1, 1), jnp.float32)
    mv4 = jnp.ones((1, C, 1, 1), jnp.float32)

    mean_r = jnp.mean(x4, axis=(0, 2, 3), keepdims=True)
    var_r = jnp.mean((x4 - mean_r) ** 2, axis=(0, 2, 3), keepdims=True)
    y_r = gamma4 * (x4 - mean_r) / jnp.sqrt(var_r + EPS) + beta4

    for ft in (False, True):        # exercise both the fast path and tiled path
        y4, nmm4, nmv4 = batch_norm_forward(x4, gamma4, beta4, mm4, mv4,
                                            force_tiled=ft)
        jax.block_until_ready((y4, nmm4, nmv4))
        assert y4.shape == x4.shape
        assert jnp.allclose(y4, y_r, atol=1e-4, rtol=1e-4)
        assert jnp.allclose(nmm4, MOMENTUM * mm4 + (1 - MOMENTUM) * mean_r,
                            atol=1e-5, rtol=1e-5)
        assert jnp.allclose(nmv4, MOMENTUM * mv4 + (1 - MOMENTUM) * var_r,
                            atol=1e-5, rtol=1e-5)

    # ---- fully-connected input (num_dims == 2) ----
    Nf, F = 8, 32
    x2 = jax.random.normal(k2, (Nf, F), dtype=jnp.float32)
    gamma2 = jnp.ones((1, F), jnp.float32)
    beta2 = jnp.zeros((1, F), jnp.float32)
    mm2 = jnp.zeros((1, F), jnp.float32)
    mv2 = jnp.ones((1, F), jnp.float32)

    mean2_r = jnp.mean(x2, axis=0)
    var2_r = jnp.mean((x2 - mean2_r) ** 2, axis=0)
    y2_r = gamma2 * (x2 - mean2_r) / jnp.sqrt(var2_r + EPS) + beta2

    for ft in (False, True):
        y2, nmm2, nmv2 = batch_norm_forward(x2, gamma2, beta2, mm2, mv2,
                                            force_tiled=ft)
        jax.block_until_ready((y2, nmm2, nmv2))
        assert jnp.allclose(y2, y2_r, atol=1e-4, rtol=1e-4)
        assert jnp.allclose(nmm2, MOMENTUM * mm2 + (1 - MOMENTUM) * mean2_r,
                            atol=1e-5, rtol=1e-5)
        assert jnp.allclose(nmv2, MOMENTUM * mv2 + (1 - MOMENTUM) * var2_r,
                            atol=1e-5, rtol=1e-5)

    print("KERNEL_OK")
</pallas_src>

<mosaic_0001>
module attributes {stable_mosaic.version = 11 : i64} {
  func.func @_bn_fused_kernel(%arg0: memref<2x4x256xf32, #tpu.memory_space<vmem>>, %arg1: memref<1x4x1xf32, #tpu.memory_space<vmem>>, %arg2: memref<1x4x1xf32, #tpu.memory_space<vmem>>, %arg3: memref<1x4x1xf32, #tpu.memory_space<vmem>>, %arg4: memref<1x4x1xf32, #tpu.memory_space<vmem>>, %arg5: memref<2x4x256xf32, #tpu.memory_space<vmem>>, %arg6: memref<1x4x1xf32, #tpu.memory_space<vmem>>, %arg7: memref<1x4x1xf32, #tpu.memory_space<vmem>>) attributes {dimension_semantics = [], scalar_prefetch = 0 : i64, scratch_operands = 0 : i64, tpu.core_type = #tpu.core_type<tc>} {
    %c0 = arith.constant 0 : index
    %c0_0 = arith.constant 0 : index
    %c0_1 = arith.constant 0 : index
    %0 = vector.load %arg0[%c0, %c0_0, %c0_1] : memref<2x4x256xf32, #tpu.memory_space<vmem>>, vector<2x4x256xf32>
    %cst = arith.constant dense<0.000000e+00> : vector<4xf32>
    %1 = vector.multi_reduction <add>, %0, %cst [0, 2] : vector<2x4x256xf32> to vector<4xf32>
    %2 = vector.shape_cast %1 : vector<4xf32> to vector<1x4x1xf32>
    %cst_2 = arith.constant 0.001953125 : f32
    %3 = vector.broadcast %cst_2 : f32 to vector<1x4x1xf32>
    %4 = arith.mulf %2, %3 : vector<1x4x1xf32>
    %5 = vector.broadcast %4 : vector<1x4x1xf32> to vector<2x4x256xf32>
    %6 = arith.subf %0, %5 : vector<2x4x256xf32>
    %7 = arith.mulf %6, %6 : vector<2x4x256xf32>
    %cst_3 = arith.constant dense<0.000000e+00> : vector<4xf32>
    %8 = vector.multi_reduction <add>, %7, %cst_3 [0, 2] : vector<2x4x256xf32> to vector<4xf32>
    %9 = vector.shape_cast %8 : vector<4xf32> to vector<1x4x1xf32>
    %cst_4 = arith.constant 0.001953125 : f32
    %10 = vector.broadcast %cst_4 : f32 to vector<1x4x1xf32>
    %11 = arith.mulf %9, %10 : vector<1x4x1xf32>
    %cst_5 = arith.constant 9.99999974E-6 : f32
    %12 = vector.broadcast %cst_5 : f32 to vector<1x4x1xf32>
    %13 = arith.addf %11, %12 : vector<1x4x1xf32>
    %14 = math.rsqrt %13 : vector<1x4x1xf32>
    %c0_6 = arith.constant 0 : index
    %c0_7 = arith.constant 0 : index
    %c0_8 = arith.constant 0 : index
    %15 = vector.load %arg1[%c0_6, %c0_7, %c0_8] : memref<1x4x1xf32, #tpu.memory_space<vmem>>, vector<1x4x1xf32>
    %16 = arith.mulf %15, %14 : vector<1x4x1xf32>
    %17 = vector.broadcast %16 : vector<1x4x1xf32> to vector<2x4x256xf32>
    %18 = arith.mulf %6, %17 : vector<2x4x256xf32>
    %c0_9 = arith.constant 0 : index
    %c0_10 = arith.constant 0 : index
    %c0_11 = arith.constant 0 : index
    %19 = vector.load %arg2[%c0_9, %c0_10, %c0_11] : memref<1x4x1xf32, #tpu.memory_space<vmem>>, vector<1x4x1xf32>
    %20 = vector.broadcast %19 : vector<1x4x1xf32> to vector<2x4x256xf32>
    %21 = arith.addf %18, %20 : vector<2x4x256xf32>
    %c0_12 = arith.constant 0 : index
    %c0_13 = arith.constant 0 : index
    %c0_14 = arith.constant 0 : index
    %22 = vector.load %arg5[%c0_12, %c0_13, %c0_14] : memref<2x4x256xf32, #tpu.memory_space<vmem>>, vector<2x4x256xf32>
    tpu.vector_store %arg5[%c0_12, %c0_13, %c0_14], %21 {strides = array<i32>} : memref<2x4x256xf32, #tpu.memory_space<vmem>>, vector<2x4x256xf32>,
    %c0_15 = arith.constant 0 : index
    %c0_16 = arith.constant 0 : index
    %c0_17 = arith.constant 0 : index
    %23 = vector.load %arg3[%c0_15, %c0_16, %c0_17] : memref<1x4x1xf32, #tpu.memory_space<vmem>>, vector<1x4x1xf32>
    %cst_18 = arith.constant 0.899999976 : f32
    %24 = vector.broadcast %cst_18 : f32 to vector<1x4x1xf32>
    %25 = arith.mulf %24, %23 : vector<1x4x1xf32>
    %cst_19 = arith.constant 1.000000e-01 : f32
    %26 = vector.broadcast %cst_19 : f32 to vector<1x4x1xf32>
    %27 = arith.mulf %26, %4 : vector<1x4x1xf32>
    %28 = arith.addf %25, %27 : vector<1x4x1xf32>
    %c0_20 = arith.constant 0 : index
    %c0_21 = arith.constant 0 : index
    %c0_22 = arith.constant 0 : index
    %29 = vector.load %arg6[%c0_20, %c0_21, %c0_22] : memref<1x4x1xf32, #tpu.memory_space<vmem>>, vector<1x4x1xf32>
    tpu.vector_store %arg6[%c0_20, %c0_21, %c0_22], %28 {strides = array<i32>} : memref<1x4x1xf32, #tpu.memory_space<vmem>>, vector<1x4x1xf32>,
    %c0_23 = arith.constant 0 : index
    %c0_24 = arith.constant 0 : index
    %c0_25 = arith.constant 0 : index
    %30 = vector.load %arg4[%c0_23, %c0_24, %c0_25] : memref<1x4x1xf32, #tpu.memory_space<vmem>>, vector<1x4x1xf32>
    %cst_26 = arith.constant 0.899999976 : f32
    %31 = vector.broadcast %cst_26 : f32 to vector<1x4x1xf32>
    %32 = arith.mulf %31, %30 : vector<1x4x1xf32>
    %cst_27 = arith.constant 1.000000e-01 : f32
    %33 = vector.broadcast %cst_27 : f32 to vector<1x4x1xf32>
    %34 = arith.mulf %33, %11 : vector<1x4x1xf32>
    %35 = arith.addf %32, %34 : vector<1x4x1xf32>
    %c0_28 = arith.constant 0 : index
    %c0_29 = arith.constant 0 : index
    %c0_30 = arith.constant 0 : index
    %36 = vector.load %arg7[%c0_28, %c0_29, %c0_30] : memref<1x4x1xf32, #tpu.memory_space<vmem>>, vector<1x4x1xf32>
    tpu.vector_store %arg7[%c0_28, %c0_29, %c0_30], %35 {strides = array<i32>} : memref<1x4x1xf32, #tpu.memory_space<vmem>>, vector<1x4x1xf32>,
    return
  }
}

</mosaic_0001>

<bundles_post_ra>
// kernel: tpu_custom_call.1
= control target key start
LH: loop header
LB: loop body
LE: loop exit
PB: predicated region body
PF: predicated region fallthrough
CT: control target
= control target key end

     0   :  { %13 = vsyncpa [#allocation3], 0  ;;  %s323_s0 = inlined_call_operand.hbm [shape: f32[2,4,256], index: 0, kind: input, shape index: {}]   ;;  %s324_s1 = inlined_call_operand.vmem [shape: f32[1,4,1], index: 1, kind: input, shape index: {}]   ;;  %s325_s2 = inlined_call_operand.vmem [shape: f32[1,4,1], index: 2, kind: input, shape index: {}]   ;;  %s326_s3 = inlined_call_operand.vmem [shape: f32[1,4,1], index: 3, kind: input, shape index: {}]   ;;  %s327_s4 = inlined_call_operand.vmem [shape: f32[1,4,1], index: 4, kind: input, shape index: {}]   ;;  %s328_s5 = inlined_call_operand.hbm [shape: f32[2,4,256], index: 5, kind: output, shape index: {0}]   ;;  %s329_s6 = inlined_call_operand.vmem [shape: f32[1,4,1], index: 6, kind: output, shape index: {1}]   ;;  %s330_s7 = inlined_call_operand.vmem [shape: f32[1,4,1], index: 7, kind: output, shape index: {2}]  }
   0x1   :  { %14 = vsyncpa [#allocation4], 0  ;;  %s19_s26 = sshll.u32 %s323_s0, 4  ;;  %s237_s27 = smov [#allocation2]   ;;  %s20_s26 = int_to_ptr.hbm [resolvable:$true] %s19_s26 }
   0x2   :  { %s21_s28 = sshll.u32 %s237_s27, 4  ;;  %s238_s29 = smov 128   ;;  %s22_s28 = int_to_ptr.vmem [resolvable:$true] %s21_s28 }
   0x3   :  { %s239_s30 = smov 8  }
   0x4   :  { %27 = dma.hbm_to_vmem [thread:$0]  %s20_s26, 256, %s22_s28, [#allocation3], %s238_s29, %s238_s29, %s239_s30  }
   0x5   :  { %233 = dma.done.wait [#allocation3], 256  }
   0x6   :  { %234 = vsyncadd [#allocation3], 4294967040  ;;  %v40_v0 = vld [vmem:[#allocation2] sm:$0xff]  ;;  %v41_v1 = vld [vmem:[#allocation2 + $0x8] sm:$0xff]  ;;  %vm55_vm0 = vcmask 1043456   ;;  %vm141_vm1 = vcmask 3072  }
   0x7   :  { %44 = vst [vmem:[#allocation1] ss:$2 sm:$0xff] %v40_v0  ;;  %v240_v13 = vmov 839922192   ;;  %v137_v15 = vld [vmem:[%s326_s3] sm:$0xf] }
   0x8   :  { %48 = vst [vmem:[#allocation1 + $0x10] ss:$2 sm:$0xff] %v41_v1  ;;  %v68_v14 = vunpack.c.l.s4 %v240_v13  ;;  %v138_v18 = vmul.f32 0.9, %v137_v15  ;;  %v241_v38 = vmov 0  }
   0x9   :  { %181 = vset.pattern.permute.xlu1 %v241_v38  ;;  %182 = vset.pattern.permute.xlu0 %v241_v38  ;;  %v143_v39 = vld [vmem:[%s327_s4] sm:$0xf] }
   0xa   :  { %v69_v16 = vunpack.c.0.s8 %v68_v14  ;;  %v144_v41 = vmul.f32 0.9, %v143_v39  ;;  %v110_v52 = vld [vmem:[%s324_s1] sm:$0xf]  ;;  %s154_s1 = sshll.u32 %s328_s5, 4  ;;  %s155_s1 = int_to_ptr.hbm [resolvable:$true] %s154_s1 }
   0xb   :  { %v123_v55 = vld [vmem:[%s325_s2] sm:$0xf] }
   0xe   :  { %v45_v2 = vld.sshfl [vmem:[#allocation1] sm:$0xff pattern:$0x75316420]  ;;  %v46_v3 = vld.sshfl [vmem:[#allocation1 + $0x8] sm:$0xff pattern:$0x75316420] }
   0xf   :  { %v49_v4 = vld.sshfl [vmem:[#allocation1 + $0x10] sm:$0xff pattern:$0x75316420]  ;;  %v50_v5 = vld.sshfl [vmem:[#allocation1 + $0x18] sm:$0xff pattern:$0x75316420] }
  0x10   :  { %v56_v6 = vsel %vm55_vm0, %v45_v2, 0.0  ;;  %v57_v7 = vsel %vm55_vm0, %v46_v3, 0.0  ;;  %v59_v8 = vsel %vm55_vm0, %v49_v4, 0.0  ;;  %v61_v10 = vsel %vm55_vm0, %v50_v5, 0.0 }
  0x11   :  { %v58_v9 = vadd.f32 %v57_v7, %v56_v6 }
  0x13   :  { %v60_v11 = vadd.f32 %v59_v8, %v58_v9 }
  0x15   :  { %v62_v12 = vadd.f32 %v61_v10, %v60_v11 }
  0x17   :  { %63 = vadd.xlane.f32.xlu0 %v62_v12 }
  0x8a   :  { %v64_v17 = vpop.xlane.xlu0 %63 }
  0x8b   :  { %v65_v19 = vmul.f32 0.001953125, %v64_v17 }
  0x8d   :  { %v70_v20 = vperm.slane %v65_v19, %v69_v16  ;;  %v139_v21 = vmul.f32 0.1, %v65_v19 }
  0x8f   :  { %v72_v22 = vsub.f32 %v40_v0, %v70_v20  ;;  %v73_v23 = vsub.f32 %v41_v1, %v70_v20  ;;  %v140_v24 = vadd.f32 %v139_v21, %v138_v18 }
  0x91   :  { %v74_v25 = vmul.f32 %v72_v22, %v72_v22  ;;  %v75_v26 = vmul.f32 %v73_v23, %v73_v23  ;;  %142 = vst.msk [vmem:[%s329_s6] sm:$0xf] %vm141_vm1, %v140_v24 }
  0x93   :  { %78 = vst [vmem:[#allocation1] ss:$2 sm:$0xff] %v74_v25 }
  0x94   :  { %82 = vst [vmem:[#allocation1 + $0x10] ss:$2 sm:$0xff] %v75_v26 }
  0x9a   :  { %v79_v27 = vld.sshfl [vmem:[#allocation1] sm:$0xff pattern:$0x75316420]  ;;  %v80_v28 = vld.sshfl [vmem:[#allocation1 + $0x8] sm:$0xff pattern:$0x75316420] }
  0x9b   :  { %v83_v29 = vld.sshfl [vmem:[#allocation1 + $0x10] sm:$0xff pattern:$0x75316420]  ;;  %v89_v30 = vsel %vm55_vm0, %v79_v27, 0.0  ;;  %v90_v31 = vsel %vm55_vm0, %v80_v28, 0.0 }
  0x9c   :  { %v84_v32 = vld.sshfl [vmem:[#allocation1 + $0x18] sm:$0xff pattern:$0x75316420]  ;;  %v91_v33 = vadd.f32 %v90_v31, %v89_v30  ;;  %v92_v34 = vsel %vm55_vm0, %v83_v29, 0.0 }
  0x9d   :  { %v94_v36 = vsel %vm55_vm0, %v84_v32, 0.0 }
  0x9e   :  { %v93_v35 = vadd.f32 %v92_v34, %v91_v33 }
  0xa0   :  { %v95_v37 = vadd.f32 %v94_v36, %v93_v35 }
  0xa2   :  { %96 = vadd.xlane.f32.xlu0 %v95_v37 }
 0x115   :  { %v97_v40 = vpop.xlane.xlu0 %96 }
 0x116   :  { %v98_v42 = vmul.f32 0.001953125, %v97_v40 }
 0x118   :  { %v99_v43 = vadd.f32 1e-05, %v98_v42  ;;  %v145_v44 = vmul.f32 0.1, %v98_v42 }
 0x11a   :  { %183 = vrsqrt.f32 %v99_v43  ;;  %v146_v45 = vadd.f32 %v145_v44, %v144_v41  ;;  %vm106_vm3 = vweird.f32 %v99_v43 }
 0x11c   :  { %147 = vst.msk [vmem:[%s330_s7] sm:$0xf] %vm141_vm1, %v146_v45  ;;  %s242_s7 = smov [#allocation5]  }
 0x11d   :  { %s152_s16 = sshll.u32 %s242_s7, 4  ;;  %s153_s16 = int_to_ptr.vmem [resolvable:$true] %s152_s16 }
 0x120   :  { %v184_v46 = vpop.eup %183 }
 0x121   :  { %v101_v47 = vmul.f32 %v184_v46, %v99_v43  ;;  %vm107_vm2 = vweird.f32 %v184_v46 }
 0x122   :  { %vm108_vm4 = vmor %vm106_vm3, %vm107_vm2 }
 0x123   :  { %v102_v48 = vmul.f32 %v184_v46, %v101_v47 }
 0x125   :  { %v103_v49 = vmul.f32 0.5, %v102_v48 }
 0x127   :  { %v104_v50 = vsub.f32 1.5, %v103_v49 }
 0x129   :  { %v105_v51 = vmul.f32 %v184_v46, %v104_v50 }
 0x12b   :  { %v109_v53 = vsel %vm108_vm4, %v184_v46, %v105_v51 }
 0x12c   :  { %v111_v54 = vmul.f32 %v110_v52, %v109_v53 }
 0x12e   :  { %114 = vperm.xlu1 %181, %v111_v54  }
 0x136   :  { %126 = vperm.xlu1 %181, %v123_v55  }
 0x1a0   :  { %v115_v56 = vpop.permute.xlu1 %114 }
 0x1a1   :  { %v119_v57 = vperm.slane %v115_v56, %v69_v16 }
 0x1a3   :  { %v121_v59 = vmul.f32 %v119_v57, %v72_v22  ;;  %v122_v60 = vmul.f32 %v119_v57, %v73_v23 }
 0x1a8   :  { %v127_v58 = vpop.permute.xlu1 %126 }
 0x1a9   :  { %v131_v61 = vperm.slane %v127_v58, %v69_v16 }
 0x1ab   :  { %v133_v62 = vadd.f32 %v131_v61, %v121_v59  ;;  %v134_v63 = vadd.f32 %v131_v61, %v122_v60 }
 0x1ad   :  { %135 = vst [vmem:[#allocation5] sm:$0xff] %v133_v62 }
 0x1ae   :  { %136 = vst [vmem:[#allocation5 + $0x8] sm:$0xff] %v134_v63 }
 0x1af   :  { %160 = dma.vmem_to_hbm [thread:$0]  %s153_s16, 256, %s155_s1, [#allocation4], %s238_s29, %s238_s29, %s239_s30  }
 0x1b0   :  { %235 = dma.done.wait [#allocation4], 256  }
 0x1b1   :  { %236 = vsyncadd [#allocation4], 4294967040 }
 0x1b2   :  { %173 = vsyncpa [#allocation3], 1 }
 0x1b3   :  { %174 = vsyncpa [#allocation4], 1 }

</bundles_post_ra>
